<compile_context>
chip_gen: v5e
topology: v5e:2x2
jax: 0.10.0
libtpu: 0.0.40
codegen_flags: <defaults>
</compile_context>

<pallas_src>
import jax
import jax.numpy as jnp
from jax.experimental import pallas as pl
from jax.experimental.pallas import tpu as pltpu

_LANE = 128
_SUBLANE = 8


def _round_up(x, m):
    return (x + m - 1) // m * m


def _vmem_capacity_bytes():
    """Per-core VMEM capacity, with a conservative fallback (v7x per-TC 64 MiB)."""
    try:
        cap = int(pltpu.get_tpu_info().vmem_capacity_bytes)
        if cap >= 16 * 1024 * 1024:
            return cap
    except Exception:
        pass
    return 64 * 1024 * 1024


# ---------------------------------------------------------------------------
# Kernels
# ---------------------------------------------------------------------------
def _linear_resident_kernel(x_ref, w_ref, b_ref, o_ref):
    # x_ref : (TM, K)        streamed per grid step (double-buffered)
    # w_ref : (K, out_p)     VMEM-resident [K, N] weight (single-buffered)
    # b_ref : (1, out_p)     VMEM-resident bias (single-buffered)
    # o_ref : (TM, out_p)    streamed per grid step
    acc = jnp.dot(x_ref[...], w_ref[...], preferred_element_type=jnp.float32)
    o_ref[...] = (acc + b_ref[...]).astype(o_ref.dtype)


def _linear_tiled_kernel(x_ref, w_ref, b_ref, o_ref, acc_ref):
    # (M, N, K)-tiled matmul with an f32 VMEM accumulator; K is the innermost
    # ("arbitrary") grid axis. Bias is added on the final K step.
    @pl.when(pl.program_id(2) == 0)
    def _init():
        acc_ref[...] = jnp.zeros_like(acc_ref)

    acc_ref[...] += jnp.dot(x_ref[...], w_ref[...],
                            preferred_element_type=jnp.float32)

    @pl.when(pl.program_id(2) == pl.num_programs(2) - 1)
    def _finalize():
        o_ref[...] = (acc_ref[...] + b_ref[...]).astype(o_ref.dtype)


# ---------------------------------------------------------------------------
# Parameter preparation (call ONCE at setup; hoisted out of the forward path)
# ---------------------------------------------------------------------------
def prepare_softmax_params(weight, bias):
    """Pad out_features up to a lane multiple and transpose weight to [K, N_pad].

    Call once at parameter-setup time; the returned tensors are reused by every
    forward call so the padded weight is not re-materialized in HBM per step.
    """
    out_features, in_features = weight.shape
    out_p = _round_up(out_features, _LANE)
    w_kn = weight.T                                  # [K, N] -- MXU-native RHS
    bias2 = bias
    if out_p != out_features:
        w_kn = jnp.pad(w_kn, ((0, 0), (0, out_p - out_features)))
        bias2 = jnp.pad(bias, (0, out_p - out_features))
    return jnp.asarray(w_kn), jnp.asarray(bias2).reshape(1, out_p), out_features


# ---------------------------------------------------------------------------
# Forward pass
# ---------------------------------------------------------------------------
def softmax_module_forward(x, w_kn, bias2, out_features, label=None):
    """Forward pass of the `Softmax` module (i.e. a Linear layer).

    x:            (B, in_features)  float32
    w_kn, bias2:  outputs of `prepare_softmax_params` ([K, N_pad] weight,
                  (1, N_pad) bias)
    out_features: logical (unpadded) output width
    label:        ignored (matches the PyTorch forward signature)
    """
    del label  # unused in the reference forward
    B, K = x.shape
    K_w, out_p = w_kn.shape
    assert K == K_w, "in_features mismatch between x and prepared weight"

    vmem_cap = _vmem_capacity_bytes()
    vmem_budget = int(vmem_cap * 0.70)          # budget for block allocations
    vmem_limit = int(vmem_cap * 0.85)           # scoped-VMEM limit with headroom
    itemsize = jnp.dtype(x.dtype).itemsize

    TM_CAP = 2048
    TM = min(TM_CAP, _round_up(B, _SUBLANE))

    # --- Path A: weight + bias stay VMEM-resident (single-buffered) ----------
    resident_bytes = (K * out_p + out_p) * itemsize

    def vmem_bytes_resident(tm):
        # double-buffered streamed x/out tiles + single-buffered resident params
        return 2 * tm * K * itemsize + 2 * tm * out_p * itemsize + resident_bytes

    if vmem_bytes_resident(_SUBLANE) <= vmem_budget:
        while TM > _SUBLANE and vmem_bytes_resident(TM) > vmem_budget:
            TM = max(_SUBLANE, _round_up(TM // 2, _SUBLANE))   # keep multiple of 8
        B_p = _round_up(B, TM)
        x_p = jnp.pad(x, ((0, B_p - B), (0, 0))) if B_p != B else x

        cost = pl.CostEstimate(
            flops=2 * B_p * K * out_p,
            transcendentals=0,
            bytes_accessed=itemsize * (B_p * K + K * out_p + out_p + B_p * out_p),
        )

        def _call(single_buffer_resident):
            if single_buffer_resident:
                w_spec = pl.BlockSpec((K, out_p), lambda i: (0, 0),
                                      pipeline_mode=pl.Buffered(1))
                b_spec = pl.BlockSpec((1, out_p), lambda i: (0, 0),
                                      pipeline_mode=pl.Buffered(1))
            else:
                w_spec = pl.BlockSpec((K, out_p), lambda i: (0, 0))
                b_spec = pl.BlockSpec((1, out_p), lambda i: (0, 0))
            return pl.pallas_call(
                _linear_resident_kernel,
                out_shape=jax.ShapeDtypeStruct((B_p, out_p), x.dtype),
                grid=(B_p // TM,),
                in_specs=[
                    pl.BlockSpec((TM, K), lambda i: (i, 0)),   # x: streamed over batch
                    w_spec,                                    # weight: VMEM-resident
                    b_spec,                                    # bias: VMEM-resident
                ],
                out_specs=pl.BlockSpec((TM, out_p), lambda i: (i, 0)),
                compiler_params=pltpu.CompilerParams(
                    dimension_semantics=("parallel",),         # shard batch over TCs
                    vmem_limit_bytes=vmem_limit,
                ),
                cost_estimate=cost,
            )(x_p, w_kn, bias2)

        try:
            out_padded = _call(True)
        except Exception:
            # Fallback if this jax version rejects single-buffered pipeline_mode.
            out_padded = _call(False)
        return out_padded[:B, :out_features]

    # --- Path B: weight too large to stay resident -> (M, N, K) tiling -------
    # TODO(synk): K-padding of the weight happens per call on this rare path;
    # hoist it into prepare_softmax_params if this path is ever hot.
    K_p = _round_up(K, _LANE)
    TK = 512 if K_p % 512 == 0 else (256 if K_p % 256 == 0 else _LANE)
    TN = 512 if out_p % 512 == 0 else (256 if out_p % 256 == 0 else _LANE)

    def vmem_bytes_tiled(tm):
        streamed = 2 * (tm * TK + TK * TN + TN + tm * TN) * itemsize
        acc = tm * TN * 4
        return streamed + acc

    while TM > _SUBLANE and vmem_bytes_tiled(TM) > vmem_budget:
        TM = max(_SUBLANE, _round_up(TM // 2, _SUBLANE))

    B_p = _round_up(B, TM)
    x_p = jnp.pad(x, ((0, B_p - B), (0, K_p - K)))
    w_p = jnp.pad(w_kn, ((0, K_p - K), (0, 0)))

    cost = pl.CostEstimate(
        flops=2 * B_p * K_p * out_p,
        transcendentals=0,
        bytes_accessed=itemsize * (B_p * K_p * (out_p // TN)
                                   + K_p * out_p * (B_p // TM)
                                   + out_p + B_p * out_p),
    )

    out_padded = pl.pallas_call(
        _linear_tiled_kernel,
        out_shape=jax.ShapeDtypeStruct((B_p, out_p), x.dtype),
        grid=(B_p // TM, out_p // TN, K_p // TK),
        in_specs=[
            pl.BlockSpec((TM, TK), lambda i, j, k: (i, k)),
            pl.BlockSpec((TK, TN), lambda i, j, k: (k, j)),
            pl.BlockSpec((1, TN), lambda i, j, k: (0, j)),
        ],
        out_specs=pl.BlockSpec((TM, TN), lambda i, j, k: (i, j)),
        scratch_shapes=[pltpu.VMEM((TM, TN), jnp.float32)],
        compiler_params=pltpu.CompilerParams(
            dimension_semantics=("parallel", "parallel", "arbitrary"),
            vmem_limit_bytes=vmem_limit,
        ),
        cost_estimate=cost,
    )(x_p, w_p, bias2)

    return out_padded[:B, :out_features]


def softmax_module_forward_raw(x, weight, bias, label=None):
    """Convenience wrapper taking PyTorch-layout (out, in) weight directly."""
    w_kn, bias2, out_features = prepare_softmax_params(weight, bias)
    return softmax_module_forward(x, w_kn, bias2, out_features, label)


if __name__ == "__main__":
    # Small shapes consistent with the module: batch=8, in_features=32, out_features=16
    B, IN, OUT = 8, 32, 16

    key = jax.random.PRNGKey(0)
    kx, kw, kb, kl = jax.random.split(key, 4)

    x = jax.random.normal(kx, (B, IN), dtype=jnp.float32)
    # Deterministic parameter init (shapes match nn.Linear(in_features, out_features))
    bound = 1.0 / (IN ** 0.5)
    weight = jax.random.uniform(kw, (OUT, IN), minval=-bound, maxval=bound,
                                dtype=jnp.float32)
    bias = jax.random.uniform(kb, (OUT,), minval=-bound, maxval=bound,
                              dtype=jnp.float32)
    label = jax.random.randint(kl, (B,), 0, OUT)   # passed but unused, like PyTorch

    # Pad / transpose parameters ONCE (hoisted out of the per-step forward).
    w_kn, bias2, out_features = prepare_softmax_params(weight, bias)

    out = softmax_module_forward(x, w_kn, bias2, out_features, label)
    out = jax.block_until_ready(out)

    # Reference check against plain JAX
    ref = x @ weight.T + bias
    assert out.shape == (B, OUT)
    assert jnp.allclose(out, ref, atol=1e-5, rtol=1e-5)

    print("KERNEL_OK")
</pallas_src>

<mosaic_0001>
module attributes {stable_mosaic.version = 11 : i64} {
  func.func @_linear_resident_kernel(%arg0: i32, %arg1: memref<8x32xf32, #tpu.memory_space<vmem>>, %arg2: memref<32x128xf32, #tpu.memory_space<vmem>>, %arg3: memref<1x128xf32, #tpu.memory_space<vmem>>, %arg4: memref<8x128xf32, #tpu.memory_space<vmem>>) attributes {dimension_semantics = [#tpu.dimension_semantics<parallel>], iteration_bounds = array<i64: 1>, scalar_prefetch = 0 : i64, scratch_operands = 0 : i64, tpu.core_type = #tpu.core_type<tc>, window_params = [{transform_indices = @transform_0, window_bounds = array<i64: 8, 32>}, {pipeline_mode = #tpu.pipeline_mode<synchronous>, transform_indices = @transform_1, window_bounds = array<i64: 32, 128>}, {pipeline_mode = #tpu.pipeline_mode<synchronous>, transform_indices = @transform_2, window_bounds = array<i64: 1, 128>}, {transform_indices = @transform_3, window_bounds = array<i64: 8, 128>}]} {
    %c0 = arith.constant 0 : index
    %c0_0 = arith.constant 0 : index
    %0 = vector.load %arg1[%c0, %c0_0] : memref<8x32xf32, #tpu.memory_space<vmem>>, vector<8x32xf32>
    %c0_1 = arith.constant 0 : index
    %c0_2 = arith.constant 0 : index
    %1 = vector.load %arg2[%c0_1, %c0_2] : memref<32x128xf32, #tpu.memory_space<vmem>>, vector<32x128xf32>
    %cst = arith.constant dense<0.000000e+00> : vector<8x128xf32>
    %2 = tpu.matmul %0, %1, %cst {dimension_numbers = #tpu.dot_dimension_numbers<[1], [0], [0], [1], [0, 0, 1, 1], [], []>} : vector<8x32xf32>, vector<32x128xf32>, vector<8x128xf32> -> vector<8x128xf32>
    %c0_3 = arith.constant 0 : index
    %c0_4 = arith.constant 0 : index
    %3 = vector.load %arg3[%c0_3, %c0_4] : memref<1x128xf32, #tpu.memory_space<vmem>>, vector<1x128xf32>
    %4 = vector.broadcast %3 : vector<1x128xf32> to vector<8x128xf32>
    %5 = arith.addf %2, %4 : vector<8x128xf32>
    %c0_5 = arith.constant 0 : index
    %c0_6 = arith.constant 0 : index
    %6 = vector.load %arg4[%c0_5, %c0_6] : memref<8x128xf32, #tpu.memory_space<vmem>>, vector<8x128xf32>
    tpu.vector_store %arg4[%c0_5, %c0_6], %5 {strides = array<i32>} : memref<8x128xf32, #tpu.memory_space<vmem>>, vector<8x128xf32>,
    return
  }
  func.func @transform_0(%arg0: i32) -> (i32, i32) {
    %c0_i32 = arith.constant 0 : i32
    %c0_i32_0 = arith.constant 0 : i32
    return %arg0, %c0_i32 : i32, i32
  }
  func.func @transform_1(%arg0: i32) -> (i32, i32) {
    %c0_i32 = arith.constant 0 : i32
    %c0_i32_0 = arith.constant 0 : i32
    %c0_i32_1 = arith.constant 0 : i32
    return %c0_i32, %c0_i32_0 : i32, i32
  }
  func.func @transform_2(%arg0: i32) -> (i32, i32) {
    %c0_i32 = arith.constant 0 : i32
    %c0_i32_0 = arith.constant 0 : i32
    %c0_i32_1 = arith.constant 0 : i32
    return %c0_i32, %c0_i32_0 : i32, i32
  }
  func.func @transform_3(%arg0: i32) -> (i32, i32) {
    %c0_i32 = arith.constant 0 : i32
    %c0_i32_0 = arith.constant 0 : i32
    return %arg0, %c0_i32 : i32, i32
  }
}

module attributes {stable_mosaic.version = 11 : i64} {
  func.func @_linear_resident_kernel(%arg0: i32, %arg1: memref<8x32xf32, #tpu.memory_space<vmem>>, %arg2: memref<32x128xf32, #tpu.memory_space<vmem>>, %arg3: memref<1x128xf32, #tpu.memory_space<vmem>>, %arg4: memref<8x128xf32, #tpu.memory_space<vmem>>) attributes {dimension_semantics = [#tpu.dimension_semantics<parallel>], iteration_bounds = array<i64: 1>, scalar_prefetch = 0 : i64, scratch_operands = 0 : i64, tpu.core_type = #tpu.core_type<tc>, window_params = [{transform_indices = @transform_0, window_bounds = array<i64: 8, 32>}, {pipeline_mode = #tpu.pipeline_mode<synchronous>, transform_indices = @transform_1, window_bounds = array<i64: 32, 128>}, {pipeline_mode = #tpu.pipeline_mode<synchronous>, transform_indices = @transform_2, window_bounds = array<i64: 1, 128>}, {transform_indices = @transform_3, window_bounds = array<i64: 8, 128>}]} {
    %c0 = arith.constant 0 : index
    %c0_0 = arith.constant 0 : index
    %0 = vector.load %arg1[%c0, %c0_0] : memref<8x32xf32, #tpu.memory_space<vmem>>, vector<8x32xf32>
    %c0_1 = arith.constant 0 : index
    %c0_2 = arith.constant 0 : index
    %1 = vector.load %arg2[%c0_1, %c0_2] : memref<32x128xf32, #tpu.memory_space<vmem>>, vector<32x128xf32>
    %cst = arith.constant dense<0.000000e+00> : vector<8x128xf32>
    %2 = tpu.matmul %0, %1, %cst {dimension_numbers = #tpu.dot_dimension_numbers<[1], [0], [0], [1], [0, 0, 1, 1], [], []>} : vector<8x32xf32>, vector<32x128xf32>, vector<8x128xf32> -> vector<8x128xf32>
    %c0_3 = arith.constant 0 : index
    %c0_4 = arith.constant 0 : index
    %3 = vector.load %arg3[%c0_3, %c0_4] : memref<1x128xf32, #tpu.memory_space<vmem>>, vector<1x128xf32>
    %4 = vector.broadcast %3 : vector<1x128xf32> to vector<8x128xf32>
    %5 = arith.addf %2, %4 : vector<8x128xf32>
    %c0_5 = arith.constant 0 : index
    %c0_6 = arith.constant 0 : index
    %6 = vector.load %arg4[%c0_5, %c0_6] : memref<8x128xf32, #tpu.memory_space<vmem>>, vector<8x128xf32>
    tpu.vector_store %arg4[%c0_5, %c0_6], %5 {strides = array<i32>} : memref<8x128xf32, #tpu.memory_space<vmem>>, vector<8x128xf32>,
    return
  }
  func.func @transform_0(%arg0: i32) -> (i32, i32) {
    %c0_i32 = arith.constant 0 : i32
    %c0_i32_0 = arith.constant 0 : i32
    return %arg0, %c0_i32 : i32, i32
  }
  func.func @transform_1(%arg0: i32) -> (i32, i32) {
    %c0_i32 = arith.constant 0 : i32
    %c0_i32_0 = arith.constant 0 : i32
    %c0_i32_1 = arith.constant 0 : i32
    return %c0_i32, %c0_i32_0 : i32, i32
  }
  func.func @transform_2(%arg0: i32) -> (i32, i32) {
    %c0_i32 = arith.constant 0 : i32
    %c0_i32_0 = arith.constant 0 : i32
    %c0_i32_1 = arith.constant 0 : i32
    return %c0_i32, %c0_i32_0 : i32, i32
  }
  func.func @transform_3(%arg0: i32) -> (i32, i32) {
    %c0_i32 = arith.constant 0 : i32
    %c0_i32_0 = arith.constant 0 : i32
    return %arg0, %c0_i32 : i32, i32
  }
}

</mosaic_0001>

<bundles_post_ra>
// kernel: tpu_custom_call.1
= control target key start
LH: loop header
LB: loop body
LE: loop exit
PB: predicated region body
PF: predicated region fallthrough
CT: control target
= control target key end

     0   :  { %8 = vsyncpa [#allocation3], 0  ;;  %s219_s0 = inlined_call_operand.hbm [shape: f32[8,32], index: 0, kind: input, shape index: {}]   ;;  %s220_s1 = inlined_call_operand.hbm [shape: f32[32,128], index: 1, kind: input, shape index: {}]   ;;  %s221_s2 = inlined_call_operand.vmem [shape: f32[1,128], index: 2, kind: input, shape index: {}]   ;;  %s222_s3 = inlined_call_operand.hbm [shape: f32[8,128], index: 3, kind: output, shape index: {}]  }
   0x1   :  { %9 = vsyncpa [#allocation6], 0 }
   0x2   :  { %10 = vsyncpa [#allocation4], 0  ;;  %s16_s14 = sshll.u32 %s219_s0, 4  ;;  %s182_s15 = smov [#allocation2]   ;;  %s17_s14 = int_to_ptr.hbm [resolvable:$true] %s16_s14 }
   0x3   :  { %s18_s16 = sshll.u32 %s182_s15, 4  ;;  %s26_s19 = sshll.u32 %s220_s1, 4  ;;  %s19_s16 = int_to_ptr.vmem [resolvable:$true] %s18_s16  ;;  %s27_s19 = int_to_ptr.hbm [resolvable:$true] %s26_s19 }
   0x4   :  { %21 = dma.hbm_to_vmem [thread:$0]  %s17_s14, 128, %s19_s16, [#allocation3]  }
   0x5   :  { %s183_s20 = smov [#allocation5]   ;;  %s184_s22 = smov 128  }
   0x6   :  { %s28_s21 = sshll.u32 %s183_s20, 4  ;;  %s185_s23 = smov 8   ;;  %s29_s21 = int_to_ptr.vmem [resolvable:$true] %s28_s21 }
   0x7   :  { %34 = dma.hbm_to_vmem [thread:$0]  %s27_s19, 512, %s29_s21, [#allocation6], %s184_s22, %s184_s22, %s185_s23  }
   0x8   :  { %176 = dma.done.wait [#allocation3], 128  }
   0x9   :  { %177 = vsyncadd [#allocation3], 4294967168 }
   0xa   :  { %178 = dma.done.wait [#allocation6], 512  }
   0xb   :  { %179 = vsyncadd [#allocation6], 4294966784  ;;  %v49_v0 = vld [vmem:[#allocation5 + $0x18] sm:$0xff]  ;;  %v48_v1 = vld [vmem:[#allocation5 + $0x10] sm:$0xff]  ;;  %vm54_vm0 = vcmask 261120   ;;  %s186_s24 = smov [#allocation7]  }
   0xc   :  { %70 = vmatpush.msra.mxu0 %v49_v0  ;;  %v47_v2 = vld [vmem:[#allocation5 + $0x8] sm:$0xff]  ;;  %v46_v3 = vld [vmem:[#allocation5] sm:$0xff]  ;;  %v45_v4 = vld [vmem:[#allocation2] sm:$0xff]  ;;  %s84_s25 = sshll.u32 %s186_s24, 4  ;;  %s86_s28 = sshll.u32 %s222_s3, 4  ;;  %s85_s25 = int_to_ptr.vmem [resolvable:$true] %s84_s25  ;;  %s87_s28 = int_to_ptr.hbm [resolvable:$true] %s86_s28 }
   0xd   :  { %v103_v5 = vld [vmem:[%s221_s2] ss:$0 sm:$0xff] }
   0xe   :  { %71 = vmatpush.msra.mxu0 %v48_v1 }
  0x10   :  { %72 = vmatpush.msra.mxu0 %v47_v2 }
  0x12   :  { %73 = vmatpush.msra.mxu0 %v46_v3 }
  0x13   :  { %97 = vmatmul.msk.f32.vlgmr.msra.gmra.mxu0 %vm54_vm0, %v45_v4 }
  0x90   :  { %v75_v6 = vpop.f32.mrf.mxu0 }
  0x91   :  { %v76_v7 = vadd.f32 %v103_v5, %v75_v6 }
  0x93   :  { %78 = vst [vmem:[#allocation7] sm:$0xff] %v76_v7 }
  0x94   :  { %89 = dma.vmem_to_hbm [thread:$0]  %s85_s25, 128, %s87_s28, [#allocation4]  }
  0x95   :  { %180 = dma.done.wait [#allocation4], 128  }
  0x96   :  { %181 = vsyncadd [#allocation4], 4294967168 }
  0x97   :  { %94 = vsyncpa [#allocation3], 1 }
  0x98   :  { %95 = vsyncpa [#allocation6], 1 }
  0x99   :  { %96 = vsyncpa [#allocation4], 1 }

// kernel: tpu_custom_call.1
= control target key start
LH: loop header
LB: loop body
LE: loop exit
PB: predicated region body
PF: predicated region fallthrough
CT: control target
= control target key end

     0   :  { %8 = vsyncpa [#allocation3], 0  ;;  %s219_s0 = inlined_call_operand.hbm [shape: f32[8,32], index: 0, kind: input, shape index: {}]   ;;  %s220_s1 = inlined_call_operand.hbm [shape: f32[32,128], index: 1, kind: input, shape index: {}]   ;;  %s221_s2 = inlined_call_operand.vmem [shape: f32[1,128], index: 2, kind: input, shape index: {}]   ;;  %s222_s3 = inlined_call_operand.hbm [shape: f32[8,128], index: 3, kind: output, shape index: {}]  }
   0x1   :  { %9 = vsyncpa [#allocation6], 0 }
   0x2   :  { %10 = vsyncpa [#allocation4], 0  ;;  %s16_s14 = sshll.u32 %s219_s0, 4  ;;  %s182_s15 = smov [#allocation2]   ;;  %s17_s14 = int_to_ptr.hbm [resolvable:$true] %s16_s14 }
   0x3   :  { %s18_s16 = sshll.u32 %s182_s15, 4  ;;  %s26_s19 = sshll.u32 %s220_s1, 4  ;;  %s19_s16 = int_to_ptr.vmem [resolvable:$true] %s18_s16  ;;  %s27_s19 = int_to_ptr.hbm [resolvable:$true] %s26_s19 }
   0x4   :  { %21 = dma.hbm_to_vmem [thread:$0]  %s17_s14, 128, %s19_s16, [#allocation3]  }
   0x5   :  { %s183_s20 = smov [#allocation5]   ;;  %s184_s22 = smov 128  }
   0x6   :  { %s28_s21 = sshll.u32 %s183_s20, 4  ;;  %s185_s23 = smov 8   ;;  %s29_s21 = int_to_ptr.vmem [resolvable:$true] %s28_s21 }
   0x7   :  { %34 = dma.hbm_to_vmem [thread:$0]  %s27_s19, 512, %s29_s21, [#allocation6], %s184_s22, %s184_s22, %s185_s23  }
   0x8   :  { %176 = dma.done.wait [#allocation3], 128  }
   0x9   :  { %177 = vsyncadd [#allocation3], 4294967168 }
   0xa   :  { %178 = dma.done.wait [#allocation6], 512  }
   0xb   :  { %179 = vsyncadd [#allocation6], 4294966784  ;;  %v49_v0 = vld [vmem:[#allocation5 + $0x18] sm:$0xff]  ;;  %v48_v1 = vld [vmem:[#allocation5 + $0x10] sm:$0xff]  ;;  %vm54_vm0 = vcmask 261120   ;;  %s186_s24 = smov [#allocation7]  }
   0xc   :  { %70 = vmatpush.msra.mxu0 %v49_v0  ;;  %v47_v2 = vld [vmem:[#allocation5 + $0x8] sm:$0xff]  ;;  %v46_v3 = vld [vmem:[#allocation5] sm:$0xff]  ;;  %v45_v4 = vld [vmem:[#allocation2] sm:$0xff]  ;;  %s84_s25 = sshll.u32 %s186_s24, 4  ;;  %s86_s28 = sshll.u32 %s222_s3, 4  ;;  %s85_s25 = int_to_ptr.vmem [resolvable:$true] %s84_s25  ;;  %s87_s28 = int_to_ptr.hbm [resolvable:$true] %s86_s28 }
   0xd   :  { %v103_v5 = vld [vmem:[%s221_s2] ss:$0 sm:$0xff] }
   0xe   :  { %71 = vmatpush.msra.mxu0 %v48_v1 }
  0x10   :  { %72 = vmatpush.msra.mxu0 %v47_v2 }
  0x12   :  { %73 = vmatpush.msra.mxu0 %v46_v3 }
  0x13   :  { %97 = vmatmul.msk.f32.vlgmr.msra.gmra.mxu0 %vm54_vm0, %v45_v4 }
  0x90   :  { %v75_v6 = vpop.f32.mrf.mxu0 }
  0x91   :  { %v76_v7 = vadd.f32 %v103_v5, %v75_v6 }
  0x93   :  { %78 = vst [vmem:[#allocation7] sm:$0xff] %v76_v7 }
  0x94   :  { %89 = dma.vmem_to_hbm [thread:$0]  %s85_s25, 128, %s87_s28, [#allocation4]  }
  0x95   :  { %180 = dma.done.wait [#allocation4], 128  }
  0x96   :  { %181 = vsyncadd [#allocation4], 4294967168 }
  0x97   :  { %94 = vsyncpa [#allocation3], 1 }
  0x98   :  { %95 = vsyncpa [#allocation6], 1 }
  0x99   :  { %96 = vsyncpa [#allocation4], 1 }

</bundles_post_ra>
